<compile_context>
chip_gen: v6e
topology: v6e:2x2x1
jax: 0.10.0
libtpu: 0.0.40
codegen_flags: <defaults>
</compile_context>

<pallas_src>
import functools

import numpy as np
import jax
import jax.numpy as jnp
from jax.experimental import pallas as pl
from jax.experimental.pallas import tpu as pltpu

PATCH = 4          # backbone conv kernel size == stride
C_IN = 4
C_FEAT = 32
NUM_CLASSES = 3


# ---------------------------------------------------------------------------
# PyTorch-exact bicubic (align_corners=False, a = -0.75) interpolation matrices
# ---------------------------------------------------------------------------
def _cubic_coeffs(t, A=-0.75):
    def cc1(x):  # |x| <= 1
        return ((A + 2.0) * x - (A + 3.0)) * x * x + 1.0

    def cc2(x):  # 1 < |x| < 2
        return ((A * x - 5.0 * A) * x + 8.0 * A) * x - 4.0 * A

    return np.stack([cc2(t + 1.0), cc1(t), cc1(1.0 - t), cc2(2.0 - t)], axis=-1)


def _bicubic_matrix(out_size, in_size):
    """Dense [out, in] matrix reproducing torch bicubic upsample, align_corners=False."""
    scale = in_size / out_size
    dst = np.arange(out_size, dtype=np.float64)
    src = scale * (dst + 0.5) - 0.5
    idx = np.floor(src).astype(np.int64)
    t = src - idx
    coeffs = _cubic_coeffs(t)                        # [out, 4]
    M = np.zeros((out_size, in_size), dtype=np.float64)
    rows = dst.astype(np.int64)
    for k in range(4):
        cols = np.clip(idx + k - 1, 0, in_size - 1)  # border-clamped taps
        np.add.at(M, (rows, cols), coeffs[:, k])
    return M.astype(np.float32)


@functools.lru_cache(maxsize=None)
def _bicubic_mats(H, W, h, w):
    """Cached separable bicubic matrices: Mh [H, h] and Mw^T [w, W]."""
    Mh = _bicubic_matrix(H, h)
    MwT = np.ascontiguousarray(_bicubic_matrix(W, w).T)
    return Mh, MwT


# ---------------------------------------------------------------------------
# Fused kernel: backbone conv-as-matmul + ReLU + 1x1 classifier + bicubic upsample
# ---------------------------------------------------------------------------
def _fused_kernel(p_ref, wb_ref, bb_ref, wc_ref, bc_ref, mh_ref, mwT_ref,
                  o_ref, logit_sc, *, h, w):
    # p_ref   : [1, cpp, hw]  transposed im2col patches, one image, lane dim = hw (compute dtype)
    # wb_ref  : [C_FEAT, cpp] backbone conv weight, flattened (c,pi,pj) (compute dtype)
    # bb_ref  : [C_FEAT, 1]   backbone bias (f32)
    # wc_ref  : [K, C_FEAT]   classifier 1x1 conv weight (f32)
    # bc_ref  : [K, 1]        classifier bias (f32)
    # mh_ref  : [H, h]        bicubic row-upsample matrix (f32)
    # mwT_ref : [w, W]        bicubic column-upsample matrix, transposed (f32)
    # o_ref   : [1, K, H, W]  NCHW output slab, lane dim = W
    # logit_sc: [K, hw]       f32 VMEM scratch: classifier logits (never written to HBM)

    # ---- channel phase: backbone conv (as matmul) + ReLU + classifier, lane dim = hw ----
    p = p_ref[0]                                                        # [cpp, hw]
    feat = jnp.dot(wb_ref[...], p, preferred_element_type=jnp.float32) + bb_ref[...]
    feat = jnp.maximum(feat, 0.0)                                       # backbone ReLU (f32)
    logit_sc[...] = (jnp.dot(wc_ref[...], feat, preferred_element_type=jnp.float32)
                     + bc_ref[...])                                     # [K, hw], stays f32

    # ---- separable bicubic upsample, per class (K=3, unrolled), W kept on the lane axis ----
    mwT = mwT_ref[...]                                                  # [w, W]
    mh = mh_ref[...]                                                    # [H, h]
    for k in range(NUM_CLASSES):
        # hw -> (h, w) relayout via static VMEM row loads from the scratch (reshape-free).
        c_k = jnp.concatenate(
            [logit_sc[k:k + 1, i * w:(i + 1) * w] for i in range(h)], axis=0)  # [h, w]
        t_k = jnp.dot(c_k, mwT, preferred_element_type=jnp.float32)     # [h, W]  (lane = W)
        o_k = jnp.dot(mh, t_k, preferred_element_type=jnp.float32)      # [H, W]  (lane = W)
        o_ref[0, k] = o_k.astype(o_ref.dtype)


# ---------------------------------------------------------------------------
# Wrapper
# ---------------------------------------------------------------------------
def simple_segmentation_model(x, params, *, compute_dtype=jnp.bfloat16,
                              out_dtype=jnp.float32):
    """x: [N, C_IN, H, W] float32 (NCHW). Returns [N, NUM_CLASSES, H, W] in out_dtype.

    compute_dtype only affects the two big MXU input streams (patches, backbone weight);
    accumulation, biases, logits and the upsample all stay f32 inside the kernel.
    """
    N, C, H, W = x.shape
    assert C == C_IN and H % PATCH == 0 and W % PATCH == 0
    h, w = H // PATCH, W // PATCH
    hw = h * w
    cpp = C * PATCH * PATCH

    # Transposed im2col: [N, C, H, W] -> [N, cpp, hw] (cpp=(c,pi,pj), hw=(i,j) row-major).
    # allow_input_fusion below lets XLA fuse this producer into the pallas_call input instead
    # of materializing it as a separate HBM tensor.
    patches = x.reshape(N, C, h, PATCH, w, PATCH).transpose(0, 1, 3, 5, 2, 4)
    patches = patches.reshape(N, cpp, hw).astype(compute_dtype)

    Mh_np, MwT_np = _bicubic_mats(H, W, h, w)        # cached per (H, W)
    Mh = jnp.asarray(Mh_np, dtype=jnp.float32)       # f32: upsample at reference precision
    MwT = jnp.asarray(MwT_np, dtype=jnp.float32)

    wb = params["wb"].astype(compute_dtype)
    wc = params["wc"].astype(jnp.float32)
    bb = params["bb"].astype(jnp.float32)
    bc = params["bc"].astype(jnp.float32)

    # VMEM budget: double-buffered patches/output blocks + small operands + f32 working set.
    isz = np.dtype(compute_dtype).itemsize
    est = (2 * (cpp * hw * isz + NUM_CLASSES * H * W * np.dtype(out_dtype).itemsize)
           + (C_FEAT * hw + 2 * NUM_CLASSES * hw + h * W + 2 * H * W) * 4
           + C_FEAT * cpp * isz + (H * h + w * W) * 4
           + (2 << 20))
    vmem_limit = int(min(64 << 20, max(32 << 20, est)))   # 64 MiB cap keeps v7x-safe

    kernel = functools.partial(_fused_kernel, h=h, w=w)

    out = pl.pallas_call(
        kernel,
        out_shape=jax.ShapeDtypeStruct((N, NUM_CLASSES, H, W), out_dtype),
        grid=(N,),
        in_specs=[
            pl.BlockSpec((1, cpp, hw), lambda n: (n, 0, 0)),          # patches (streamed)
            pl.BlockSpec((C_FEAT, cpp), lambda n: (0, 0)),            # wb
            pl.BlockSpec((C_FEAT, 1), lambda n: (0, 0)),              # bb
            pl.BlockSpec((NUM_CLASSES, C_FEAT), lambda n: (0, 0)),    # wc
            pl.BlockSpec((NUM_CLASSES, 1), lambda n: (0, 0)),         # bc
            pl.BlockSpec((H, h), lambda n: (0, 0)),                   # Mh
            pl.BlockSpec((w, W), lambda n: (0, 0)),                   # Mw^T
        ],
        out_specs=pl.BlockSpec((1, NUM_CLASSES, H, W), lambda n: (n, 0, 0, 0)),
        scratch_shapes=[pltpu.VMEM((NUM_CLASSES, hw), jnp.float32)],  # logits stay in VMEM
        compiler_params=pltpu.CompilerParams(
            dimension_semantics=("parallel",),
            vmem_limit_bytes=vmem_limit,
            allow_input_fusion=[True, False, False, False, False, False, False],
        ),
    )(patches, wb, bb, wc, bc, Mh, MwT)

    return out  # NCHW: [N, NUM_CLASSES, H, W]


def init_params(key):
    k1, k2, k3, k4 = jax.random.split(key, 4)
    cpp = C_IN * PATCH * PATCH
    return {
        # backbone Conv2d(C_IN, C_FEAT, kernel=4, stride=4) weight, flattened [F, (c,pi,pj)]
        "wb": jax.random.normal(k1, (C_FEAT, cpp), jnp.float32) * 0.1,
        "bb": jax.random.normal(k2, (C_FEAT, 1), jnp.float32) * 0.1,
        # classifier Conv2d(C_FEAT, NUM_CLASSES, kernel=1) weight as [K, C_FEAT]
        "wc": jax.random.normal(k3, (NUM_CLASSES, C_FEAT), jnp.float32) * 0.1,
        "bc": jax.random.normal(k4, (NUM_CLASSES, 1), jnp.float32) * 0.1,
    }


def reference_forward(x, params):
    """Pure-JAX f32 reference with identical math (for correctness checking)."""
    N, C, H, W = x.shape
    h, w = H // PATCH, W // PATCH
    cpp = C * PATCH * PATCH
    patches = x.reshape(N, C, h, PATCH, w, PATCH).transpose(0, 1, 3, 5, 2, 4)
    patches = patches.reshape(N, cpp, h * w)
    f = jnp.einsum("fc,ncl->nfl", params["wb"], patches) + params["bb"][None]
    f = jnp.maximum(f, 0.0)
    c = jnp.einsum("kf,nfl->nkl", params["wc"], f) + params["bc"][None]
    c = c.reshape(N, NUM_CLASSES, h, w)
    Mh_np, MwT_np = _bicubic_mats(H, W, h, w)
    Mh, MwT = jnp.asarray(Mh_np), jnp.asarray(MwT_np)
    t = jnp.einsum("ai,nkij->nkaj", Mh, c)
    return jnp.einsum("nkaj,jb->nkab", t, MwT)


if __name__ == "__main__":
    key = jax.random.PRNGKey(0)
    kx, kp = jax.random.split(key)
    x = jax.random.normal(kx, (2, C_IN, 16, 16), jnp.float32)   # NCHW input
    params = init_params(kp)

    out = simple_segmentation_model(x, params)
    jax.block_until_ready(out)
    assert out.shape == (2, NUM_CLASSES, 16, 16)
    assert out.dtype == jnp.float32

    ref = reference_forward(x, params)
    assert jnp.allclose(out, ref, rtol=2e-2, atol=2e-2), \
        float(jnp.max(jnp.abs(out - ref)))

    print("KERNEL_OK")
</pallas_src>

<mosaic_0001>
module attributes {stable_mosaic.version = 11 : i64} {
  func.func @_fused_kernel(%arg0: i32, %arg1: memref<1x64x16xbf16, #tpu.memory_space<vmem>>, %arg2: memref<32x64xbf16, #tpu.memory_space<vmem>>, %arg3: memref<32x1xf32, #tpu.memory_space<vmem>>, %arg4: memref<3x32xf32, #tpu.memory_space<vmem>>, %arg5: memref<3x1xf32, #tpu.memory_space<vmem>>, %arg6: memref<16x4xf32, #tpu.memory_space<vmem>>, %arg7: memref<4x16xf32, #tpu.memory_space<vmem>>, %arg8: memref<1x3x16x16xf32, #tpu.memory_space<vmem>>, %arg9: memref<3x16xf32, #tpu.memory_space<vmem>>) attributes {dimension_semantics = [#tpu.dimension_semantics<parallel>], iteration_bounds = array<i64: 2>, scalar_prefetch = 0 : i64, scratch_operands = 1 : i64, tpu.core_type = #tpu.core_type<tc>, window_params = [{transform_indices = @transform_0, window_bounds = array<i64: 1, 64, 16>}, {pipeline_mode = #tpu.pipeline_mode<synchronous>, transform_indices = @transform_1, window_bounds = array<i64: 32, 64>}, {pipeline_mode = #tpu.pipeline_mode<synchronous>, transform_indices = @transform_2, window_bounds = array<i64: 32, 1>}, {pipeline_mode = #tpu.pipeline_mode<synchronous>, transform_indices = @transform_3, window_bounds = array<i64: 3, 32>}, {pipeline_mode = #tpu.pipeline_mode<synchronous>, transform_indices = @transform_4, window_bounds = array<i64: 3, 1>}, {pipeline_mode = #tpu.pipeline_mode<synchronous>, transform_indices = @transform_5, window_bounds = array<i64: 16, 4>}, {pipeline_mode = #tpu.pipeline_mode<synchronous>, transform_indices = @transform_6, window_bounds = array<i64: 4, 16>}, {transform_indices = @transform_7, window_bounds = array<i64: 1, 3, 16, 16>}]} {
    %c0 = arith.constant 0 : index
    %c0_0 = arith.constant 0 : index
    %c0_1 = arith.constant 0 : index
    %0 = vector.load %arg1[%c0, %c0_0, %c0_1] : memref<1x64x16xbf16, #tpu.memory_space<vmem>>, vector<1x64x16xbf16>
    %1 = vector.shape_cast %0 : vector<1x64x16xbf16> to vector<64x16xbf16>
    %c0_2 = arith.constant 0 : index
    %c0_3 = arith.constant 0 : index
    %2 = vector.load %arg2[%c0_2, %c0_3] : memref<32x64xbf16, #tpu.memory_space<vmem>>, vector<32x64xbf16>
    %cst = arith.constant dense<0.000000e+00> : vector<32x16xf32>
    %3 = tpu.matmul %2, %1, %cst {dimension_numbers = #tpu.dot_dimension_numbers<[1], [0], [0], [1], [0, 0, 1, 1], [], []>} : vector<32x64xbf16>, vector<64x16xbf16>, vector<32x16xf32> -> vector<32x16xf32>
    %c0_4 = arith.constant 0 : index
    %c0_5 = arith.constant 0 : index
    %4 = vector.load %arg3[%c0_4, %c0_5] : memref<32x1xf32, #tpu.memory_space<vmem>>, vector<32x1xf32>
    %5 = vector.broadcast %4 : vector<32x1xf32> to vector<32x16xf32>
    %6 = arith.addf %3, %5 : vector<32x16xf32>
    %cst_6 = arith.constant 0.000000e+00 : f32
    %7 = vector.broadcast %cst_6 : f32 to vector<32x16xf32>
    %8 = arith.maximumf %6, %7 : vector<32x16xf32>
    %c0_7 = arith.constant 0 : index
    %c0_8 = arith.constant 0 : index
    %9 = vector.load %arg4[%c0_7, %c0_8] : memref<3x32xf32, #tpu.memory_space<vmem>>, vector<3x32xf32>
    %cst_9 = arith.constant dense<0.000000e+00> : vector<3x16xf32>
    %10 = tpu.matmul %9, %8, %cst_9 {dimension_numbers = #tpu.dot_dimension_numbers<[1], [0], [0], [1], [0, 0, 1, 1], [], []>} : vector<3x32xf32>, vector<32x16xf32>, vector<3x16xf32> -> vector<3x16xf32>
    %c0_10 = arith.constant 0 : index
    %c0_11 = arith.constant 0 : index
    %11 = vector.load %arg5[%c0_10, %c0_11] : memref<3x1xf32, #tpu.memory_space<vmem>>, vector<3x1xf32>
    %12 = vector.broadcast %11 : vector<3x1xf32> to vector<3x16xf32>
    %13 = arith.addf %10, %12 : vector<3x16xf32>
    %c0_12 = arith.constant 0 : index
    %c0_13 = arith.constant 0 : index
    %14 = vector.load %arg9[%c0_12, %c0_13] : memref<3x16xf32, #tpu.memory_space<vmem>>, vector<3x16xf32>
    tpu.vector_store %arg9[%c0_12, %c0_13], %13 {strides = array<i32>} : memref<3x16xf32, #tpu.memory_space<vmem>>, vector<3x16xf32>,
    %c0_14 = arith.constant 0 : index
    %c0_15 = arith.constant 0 : index
    %15 = vector.load %arg7[%c0_14, %c0_15] : memref<4x16xf32, #tpu.memory_space<vmem>>, vector<4x16xf32>
    %c0_16 = arith.constant 0 : index
    %c0_17 = arith.constant 0 : index
    %16 = vector.load %arg6[%c0_16, %c0_17] : memref<16x4xf32, #tpu.memory_space<vmem>>, vector<16x4xf32>
    %c0_18 = arith.constant 0 : index
    %c0_19 = arith.constant 0 : index
    %17 = vector.load %arg9[%c0_18, %c0_19] : memref<3x16xf32, #tpu.memory_space<vmem>>, vector<1x4xf32>
    %c0_20 = arith.constant 0 : index
    %c4 = arith.constant 4 : index
    %18 = vector.load %arg9[%c0_20, %c4] : memref<3x16xf32, #tpu.memory_space<vmem>>, vector<1x4xf32>
    %c0_21 = arith.constant 0 : index
    %c8 = arith.constant 8 : index
    %19 = vector.load %arg9[%c0_21, %c8] : memref<3x16xf32, #tpu.memory_space<vmem>>, vector<1x4xf32>
    %c0_22 = arith.constant 0 : index
    %c12 = arith.constant 12 : index
    %20 = vector.load %arg9[%c0_22, %c12] : memref<3x16xf32, #tpu.memory_space<vmem>>, vector<1x4xf32>
    %21 = tpu.concatenate %17, %18, %19, %20 in 0 : vector<1x4xf32>, vector<1x4xf32>, vector<1x4xf32>, vector<1x4xf32> -> vector<4x4xf32>
    %cst_23 = arith.constant dense<0.000000e+00> : vector<4x16xf32>
    %22 = tpu.matmul %21, %15, %cst_23 {dimension_numbers = #tpu.dot_dimension_numbers<[1], [0], [0], [1], [0, 0, 1, 1], [], []>} : vector<4x4xf32>, vector<4x16xf32>, vector<4x16xf32> -> vector<4x16xf32>
    %cst_24 = arith.constant dense<0.000000e+00> : vector<16x16xf32>
    %23 = tpu.matmul %16, %22, %cst_24 {dimension_numbers = #tpu.dot_dimension_numbers<[1], [0], [0], [1], [0, 0, 1, 1], [], []>} : vector<16x4xf32>, vector<4x16xf32>, vector<16x16xf32> -> vector<16x16xf32>
    %c0_25 = arith.constant 0 : index
    %c0_26 = arith.constant 0 : index
    %c0_27 = arith.constant 0 : index
    %c0_28 = arith.constant 0 : index
    %24 = vector.load %arg8[%c0_25, %c0_26, %c0_27, %c0_28] : memref<1x3x16x16xf32, #tpu.memory_space<vmem>>, vector<1x1x16x16xf32>
    %25 = vector.shape_cast %24 : vector<1x1x16x16xf32> to vector<16x16xf32>
    %26 = vector.shape_cast %23 : vector<16x16xf32> to vector<1x1x16x16xf32>
    tpu.vector_store %arg8[%c0_25, %c0_26, %c0_27, %c0_28], %26 {strides = array<i32>} : memref<1x3x16x16xf32, #tpu.memory_space<vmem>>, vector<1x1x16x16xf32>,
    %c1 = arith.constant 1 : index
    %c0_29 = arith.constant 0 : index
    %27 = vector.load %arg9[%c1, %c0_29] : memref<3x16xf32, #tpu.memory_space<vmem>>, vector<1x4xf32>
    %c1_30 = arith.constant 1 : index
    %c4_31 = arith.constant 4 : index
    %28 = vector.load %arg9[%c1_30, %c4_31] : memref<3x16xf32, #tpu.memory_space<vmem>>, vector<1x4xf32>
    %c1_32 = arith.constant 1 : index
    %c8_33 = arith.constant 8 : index
    %29 = vector.load %arg9[%c1_32, %c8_33] : memref<3x16xf32, #tpu.memory_space<vmem>>, vector<1x4xf32>
    %c1_34 = arith.constant 1 : index
    %c12_35 = arith.constant 12 : index
    %30 = vector.load %arg9[%c1_34, %c12_35] : memref<3x16xf32, #tpu.memory_space<vmem>>, vector<1x4xf32>
    %31 = tpu.concatenate %27, %28, %29, %30 in 0 : vector<1x4xf32>, vector<1x4xf32>, vector<1x4xf32>, vector<1x4xf32> -> vector<4x4xf32>
    %cst_36 = arith.constant dense<0.000000e+00> : vector<4x16xf32>
    %32 = tpu.matmul %31, %15, %cst_36 {dimension_numbers = #tpu.dot_dimension_numbers<[1], [0], [0], [1], [0, 0, 1, 1], [], []>} : vector<4x4xf32>, vector<4x16xf32>, vector<4x16xf32> -> vector<4x16xf32>
    %cst_37 = arith.constant dense<0.000000e+00> : vector<16x16xf32>
    %33 = tpu.matmul %16, %32, %cst_37 {dimension_numbers = #tpu.dot_dimension_numbers<[1], [0], [0], [1], [0, 0, 1, 1], [], []>} : vector<16x4xf32>, vector<4x16xf32>, vector<16x16xf32> -> vector<16x16xf32>
    %c0_38 = arith.constant 0 : index
    %c1_39 = arith.constant 1 : index
    %c0_40 = arith.constant 0 : index
    %c0_41 = arith.constant 0 : index
    %34 = vector.load %arg8[%c0_38, %c1_39, %c0_40, %c0_41] : memref<1x3x16x16xf32, #tpu.memory_space<vmem>>, vector<1x1x16x16xf32>
    %35 = vector.shape_cast %34 : vector<1x1x16x16xf32> to vector<16x16xf32>
    %36 = vector.shape_cast %33 : vector<16x16xf32> to vector<1x1x16x16xf32>
    tpu.vector_store %arg8[%c0_38, %c1_39, %c0_40, %c0_41], %36 {strides = array<i32>} : memref<1x3x16x16xf32, #tpu.memory_space<vmem>>, vector<1x1x16x16xf32>,
    %c2 = arith.constant 2 : index
    %c0_42 = arith.constant 0 : index
    %37 = vector.load %arg9[%c2, %c0_42] : memref<3x16xf32, #tpu.memory_space<vmem>>, vector<1x4xf32>
    %c2_43 = arith.constant 2 : index
    %c4_44 = arith.constant 4 : index
    %38 = vector.load %arg9[%c2_43, %c4_44] : memref<3x16xf32, #tpu.memory_space<vmem>>, vector<1x4xf32>
    %c2_45 = arith.constant 2 : index
    %c8_46 = arith.constant 8 : index
    %39 = vector.load %arg9[%c2_45, %c8_46] : memref<3x16xf32, #tpu.memory_space<vmem>>, vector<1x4xf32>
    %c2_47 = arith.constant 2 : index
    %c12_48 = arith.constant 12 : index
    %40 = vector.load %arg9[%c2_47, %c12_48] : memref<3x16xf32, #tpu.memory_space<vmem>>, vector<1x4xf32>
    %41 = tpu.concatenate %37, %38, %39, %40 in 0 : vector<1x4xf32>, vector<1x4xf32>, vector<1x4xf32>, vector<1x4xf32> -> vector<4x4xf32>
    %cst_49 = arith.constant dense<0.000000e+00> : vector<4x16xf32>
    %42 = tpu.matmul %41, %15, %cst_49 {dimension_numbers = #tpu.dot_dimension_numbers<[1], [0], [0], [1], [0, 0, 1, 1], [], []>} : vector<4x4xf32>, vector<4x16xf32>, vector<4x16xf32> -> vector<4x16xf32>
    %cst_50 = arith.constant dense<0.000000e+00> : vector<16x16xf32>
    %43 = tpu.matmul %16, %42, %cst_50 {dimension_numbers = #tpu.dot_dimension_numbers<[1], [0], [0], [1], [0, 0, 1, 1], [], []>} : vector<16x4xf32>, vector<4x16xf32>, vector<16x16xf32> -> vector<16x16xf32>
    %c0_51 = arith.constant 0 : index
    %c2_52 = arith.constant 2 : index
    %c0_53 = arith.constant 0 : index
    %c0_54 = arith.constant 0 : index
    %44 = vector.load %arg8[%c0_51, %c2_52, %c0_53, %c0_54] : memref<1x3x16x16xf32, #tpu.memory_space<vmem>>, vector<1x1x16x16xf32>
    %45 = vector.shape_cast %44 : vector<1x1x16x16xf32> to vector<16x16xf32>
    %46 = vector.shape_cast %43 : vector<16x16xf32> to vector<1x1x16x16xf32>
    tpu.vector_store %arg8[%c0_51, %c2_52, %c0_53, %c0_54], %46 {strides = array<i32>} : memref<1x3x16x16xf32, #tpu.memory_space<vmem>>, vector<1x1x16x16xf32>,
    return
  }
  func.func @transform_0(%arg0: i32) -> (i32, i32, i32) {
    %c0_i32 = arith.constant 0 : i32
    %c0_i32_0 = arith.constant 0 : i32
    %c0_i32_1 = arith.constant 0 : i32
    return %arg0, %c0_i32, %c0_i32_0 : i32, i32, i32
  }
  func.func @transform_1(%arg0: i32) -> (i32, i32) {
    %c0_i32 = arith.constant 0 : i32
    %c0_i32_0 = arith.constant 0 : i32
    %c0_i32_1 = arith.constant 0 : i32
    return %c0_i32, %c0_i32_0 : i32, i32
  }
  func.func @transform_2(%arg0: i32) -> (i32, i32) {
    %c0_i32 = arith.constant 0 : i32
    %c0_i32_0 = arith.constant 0 : i32
    %c0_i32_1 = arith.constant 0 : i32
    return %c0_i32, %c0_i32_0 : i32, i32
  }
  func.func @transform_3(%arg0: i32) -> (i32, i32) {
    %c0_i32 = arith.constant 0 : i32
    %c0_i32_0 = arith.constant 0 : i32
    %c0_i32_1 = arith.constant 0 : i32
    return %c0_i32, %c0_i32_0 : i32, i32
  }
  func.func @transform_4(%arg0: i32) -> (i32, i32) {
    %c0_i32 = arith.constant 0 : i32
    %c0_i32_0 = arith.constant 0 : i32
    %c0_i32_1 = arith.constant 0 : i32
    return %c0_i32, %c0_i32_0 : i32, i32
  }
  func.func @transform_5(%arg0: i32) -> (i32, i32) {
    %c0_i32 = arith.constant 0 : i32
    %c0_i32_0 = arith.constant 0 : i32
    %c0_i32_1 = arith.constant 0 : i32
    return %c0_i32, %c0_i32_0 : i32, i32
  }
  func.func @transform_6(%arg0: i32) -> (i32, i32) {
    %c0_i32 = arith.constant 0 : i32
    %c0_i32_0 = arith.constant 0 : i32
    %c0_i32_1 = arith.constant 0 : i32
    return %c0_i32, %c0_i32_0 : i32, i32
  }
  func.func @transform_7(%arg0: i32) -> (i32, i32, i32, i32) {
    %c0_i32 = arith.constant 0 : i32
    %c0_i32_0 = arith.constant 0 : i32
    %c0_i32_1 = arith.constant 0 : i32
    %c0_i32_2 = arith.constant 0 : i32
    return %arg0, %c0_i32, %c0_i32_0, %c0_i32_1 : i32, i32, i32, i32
  }
}

</mosaic_0001>

<bundles_post_ra>
// kernel: tpu_custom_call.1
= control target key start
LH: loop header
LB: loop body
LE: loop exit
PB: predicated region body
PF: predicated region fallthrough
CT: control target
= control target key end

     0   :  { %12 = vsyncpa [#allocation4], 0  ;;  %s1576_s0 = inlined_call_operand.vmem [shape: bf16[2,64,16], index: 0, kind: input, shape index: {}]   ;;  %s1577_s1 = inlined_call_operand.vmem [shape: bf16[32,64], index: 1, kind: input, shape index: {}]   ;;  %s1578_s2 = inlined_call_operand.vmem [shape: f32[32,1], index: 2, kind: input, shape index: {}]   ;;  %s1579_s3 = inlined_call_operand.vmem [shape: f32[3,32], index: 3, kind: input, shape index: {}]   ;;  %s1580_s4 = inlined_call_operand.vmem [shape: f32[3,1], index: 4, kind: input, shape index: {}]   ;;  %s1581_s5 = inlined_call_operand.vmem [shape: f32[16,4], index: 5, kind: input, shape index: {}]   ;;  %s1582_s6 = inlined_call_operand.vmem [shape: f32[4,16], index: 6, kind: input, shape index: {}]   ;;  %s1583_s7 = inlined_call_operand.hbm [shape: f32[2,3,16,16], index: 7, kind: output, shape index: {}]  }
   0x1   :  { %14 = vsyncpa [#allocation4 + $0x1], 0  ;;  %s1382_s24 = smov 0   ;;  %s1384_s25 = smov 0  }
   0x2   :  { %s1386_s26 = smov 0   ;;  %s1388_s27 = smov 0  }
   0x3 LB: > { %s1403_s28 = sadd.s32 4294967295, %s1331_s27   ;;  %s1097_s29 = sadd.s32 4294967294, %s1331_s27   ;;  %s1331_s27 = sphi %s1388_s27, %s1589_s27   ;;  %s1327_s26 = sphi %s1386_s26, %s1588_s26   ;;  %s1323_s25 = sphi %s1384_s25, %s1587_s25   ;;  %s1319_s24 = sphi %s1382_s24, %s1586_s24  }
   0x4   : > { %s1407_s30 = sadd.s32 1, %s1331_s27   ;;  %s179_s8 = sadd.s32 1, %s1327_s26 }
   0x5   : > { %s176_s9 = ssub.s32 %s1331_s27, %s1407_s30  ;;  %p189_p0 = scmp.ne.s32.totalorder %s1327_s26, %s1323_s25 }
   0x6   : > { %p177_p1 = scmp.eq.s32.totalorder %s176_s9, 0  ;;  %p190_p2 = scmp.eq.s32.totalorder %s1403_s28, 1 }
   0x7   : > { %p195_p3 = scmp.ne.s32.totalorder %s1323_s25, %s1319_s24  ;;  %p196_p4 = scmp.eq.s32.totalorder %s1097_s29, 1 }
   0x8   : > { %s1418_s10 = scalar_select %p177_p1, %s1327_s26, %s179_s8  }
   0x9   : > { %p1420_p5 = por %p190_p2, %p189_p0  ;;  %p1424_p6 = por %p196_p4, %p195_p3 }
   0xa   : > { %p1100_p7 = scmp.ge.s32.totalorder %s1331_s27, 1  ;;  %p240_p8 = scmp.lt.s32.totalorder %s1331_s27, 3 }
   0xc   : > { %p241_p9 = pnand %p1100_p7, %p240_p8 }
   0xd   : > { %p272_p10 = scmp.lt.s32.totalorder (!%p241_p9), %s1403_s28, 1  ;;  %s1336_s22 = smov (!%p241_p9), 120  }
   0xe   : > { %244 = sbr.rel (%p241_p9) target bundleno = 1180 (0x49c), region = 48  ;;  %s1338_s29 = smov (!%p241_p9), 116  }
   0xf   : > { %s1215_s19 = smul.u32 (!%p241_p9), 768, %s1403_s28 }
  0x13   : > { %v1269_v0 = vld [vmem:[%s1577_s1] sm:$0xff]   ;;  %vm348_vm0 = vcmask 523264   ;;  %s273_s15 = scalar_select %p272_p10, %s1403_s28, 1  ;;  %v293_v1 = vld [vmem:[%s1578_s2 + $0x18] sm:$0xff]  ;;  %v291_v2 = vld [vmem:[%s1578_s2 + $0x8] sm:$0xff]  ;;  %v1333_v3 = vmov 0  }
  0x14   : > { %1169 = vmatprep.mubr.msk.bf16.mxu0 %vm348_vm0, %v1269_v0  ;;  %1263 = vset.pattern.permute.xlu0 %v1333_v3  ;;  %v292_v4 = vld [vmem:[%s1578_s2 + $0x10] sm:$0xff]  ;;  %v290_v5 = vld [vmem:[%s1578_s2] sm:$0xff]  ;;  %v1270_v11 = vld [vmem:[%s1577_s1 + $0x8] sm:$0xff]   ;;  %v1334_v12 = vmov 0.0   ;;  %vm1335_vm1 = vmmov 0   ;;  %vm415_vm2 = vcmask 261120  }
  0x15   : > { %1264 = vset.pattern.permute.xlu1 %v1333_v3  ;;  %s1134_s20 = sshll.u32 %s273_s15, 5  ;;  %311 = vperm.xlu0 %1263, %v293_v1   ;;  %v409_v8 = vld [vmem:[%s1580_s4] sm:$0x7]  ;;  %vm489_vm3 = vcmask 124928   ;;  %vm518_vm4 = vcmask 1043456   ;;  %vm508_vm5 = vcmask 1040384  }
  0x16   : > { %301 = vperm.xlu1 %1264, %v291_v2   ;;  %s276_s23 = scalar_lea.vmem %s1576_s0, %s1134_s20  ;;  %1173 = vmatprep.subr.mxu1 %v1334_v12  ;;  %v408_v29 = vld [vmem:[%s1579_s3] sm:$0x7]  ;;  %vm510_vm6 = vcmask 1041408   ;;  %vm512_vm7 = vcmask 1042432   ;;  %vm514_vm8 = vcmask 31744   ;;  %v493_v3 = vld [vmem:[%s1581_s5 + $0x8] sm:$0xff] }
  0x17   : > { %v1265_v6 = vld [vmem:[%s276_s23 + $0x18] sm:$0xff]   ;;  %v1266_v7 = vld [vmem:[%s276_s23 + $0x10] sm:$0xff]   ;;  %v1267_v9 = vld [vmem:[%s276_s23 + $0x8] sm:$0xff]   ;;  %1181 = vmatprep.mubr.msk.f32.mxu1 %vm1335_vm1, %v1334_v12  ;;  %s269_s15 = sand.u32 1, %s1323_s25   ;;  %vm676_vm9 = vcmask 130048  }
  0x18   : > { %1161 = vmatprep.subr.bf16.mxu0 %v1265_v6  ;;  %v1268_v10 = vld [vmem:[%s276_s23] sm:$0xff]   ;;  %s1337_s23 = smov 124   ;;  %s1214_s16 = smul.u32 48, %s269_s15 }
  0x19   : > { %306 = vperm.xlu0 %1263, %v292_v4   ;;  %1162 = vmatpush3.bf16.msra.mxu0 %v1265_v6  ;;  %v1473_v34 = vld [vmem:[%s1582_s6] sm:$0xf]  ;;  %s1536_s28 = scalar_lea.sflag [#allocation4], %s269_s15 }
  0x1a   : > { %296 = vperm.xlu1 %1264, %v290_v5   ;;  %1163 = vmatprep.subr.bf16.mxu0 %v1266_v7  ;;  %v492_v1 = vld [vmem:[%s1581_s5] sm:$0xff]  ;;  %s271_s17 = scalar_lea.vmem [#allocation3], %s1214_s16 }
  0x1b   : > { %s1035_s18 = sshll.u32 %s271_s17, 4  ;;  %s1525_s18 = int_to_ptr.vmem [resolvable:$true] %s1035_s18 }
  0x1d   : > { %412 = vperm.xlu0 %1263, %v409_v8   ;;  %1164 = vmatpush3.bf16.msra.mxu0 %v1266_v7 }
  0x1e   : > { %1165 = vmatprep.subr.bf16.mxu0 %v1267_v9 }
  0x21   : > { %1166 = vmatpush3.bf16.msra.mxu0 %v1267_v9 }
  0x22   : > { %1167 = vmatprep.subr.bf16.mxu0 %v1268_v10 }
  0x25   : > { %1168 = vmatpush3.bf16.msra.mxu0 %v1268_v10 }
  0x28   : > { %1170 = vmatmul.mubr.msk.bf16.vlgmr.msra.gmra.mxu0 %vm348_vm0, %v1270_v11 }
  0x29   : > { %1201 = vmatprep.mubr.msk.f32.mxu0 %vm514_vm8, %v492_v1 }
  0x90   : > { %v312_v13 = vpop.permute.xlu0 %311 }
  0x91   : > { %v302_v14 = vpop.permute.xlu1 %301 }
  0x94   : > { %v307_v17 = vpop.permute.xlu0 %306 }
  0x95   : > { %v297_v21 = vpop.permute.xlu1 %296 }
  0x98   : > { %v413_v30 = vpop.permute.xlu0 %412 }
  0xe8   : > { %v1171_v15 = vpop.f32.mrf.mxu0 }
  0xe9   : > { %v398_v19 = vadd.f32 %v1171_v15, %v307_v17 }
  0xea   : > { %v389_v16 = vpop.f32.mrf.mxu0 }
  0xeb   : > { %v406_v25 = vmax.f32 %v398_v19, 0.0  ;;  %v390_v26 = vadd.f32 %v389_v16, %v297_v21 }
  0xec   : > { %v1172_v18 = vpop.f32.mrf.mxu0 }
  0xed   : > { %v401_v20 = vadd.f32 %v1172_v18, %v312_v13  ;;  %v404_v28 = vmax.f32 %v390_v26, 0.0 }
  0xee   : > { %v392_v22 = vpop.f32.mrf.mxu0 }
  0xef   : > { %v407_v23 = vmax.f32 %v401_v20, 0.0  ;;  %v393_v24 = vadd.f32 %v392_v22, %v302_v14 }
  0xf1   : > { %1174 = vmatpush3.msra.mxu1 %v407_v23  ;;  %v405_v27 = vmax.f32 %v393_v24, 0.0 }
  0xf2   : > { %1175 = vmatprep.subr.mxu1 %v1334_v12 }
  0xf3   : > { %1176 = vmatpush3.msra.mxu1 %v406_v25 }
  0xf4   : > { %1177 = vmatprep.subr.mxu1 %v1334_v12 }
  0xf5   : > { %1178 = vmatpush3.msra.mxu1 %v405_v27 }
  0xf6   : > { %1179 = vmatprep.subr.mxu1 %v1334_v12 }
  0xf7   : > { %1180 = vmatpush3.msra.mxu1 %v404_v28 }
  0xf8   : > { %1182 = vmatmul.mubr.msk.f32.vlgmr.msra.gmra.mxu1 %vm415_vm2, %v408_v29  ;;  %1184 = vmatprep.subr.mxu1 %v1334_v12 }
  0xf9   : > { %1186 = vmatprep.mubr.msk.f32.mxu1 %vm1335_vm1, %v1334_v12  ;;  %1185 = vmatpush3.msk.msra.mxu1 %vm518_vm4, %v1473_v34 }
 0x1b8   : > { %v485_v31 = vpop.f32.mrf.mxu1 }
 0x1b9   : > { %v486_v32 = vadd.f32 %v485_v31, %v413_v30 }
 0x1ba   : > { %v1183_v33 = vpop.f32.mrf.mxu1 }
 0x1bb   : > { %490 = vst.msk [vmem:[#allocation2] sm:$0x7] %vm489_vm3, %v486_v32 }
 0x1c2   : > { %v494_v35 = vld [vmem:[#allocation2] sm:$0x1]  ;;  %v679_v38 = vld [vmem:[#allocation2 + $0x1] sm:$0x1]  ;;  %v850_v43 = vld [vmem:[#allocation2 + $0x2] sm:$0x1] }
 0x1c3   : > { %v500_v36 = vrot.slane %v494_v35, 6  ;;  %v496_v37 = vrot.slane %v494_v35, 7  ;;  %v681_v39 = vrot.slane %v679_v38, 7  ;;  %v504_v40 = vrot.slane %v494_v35, 5 }
 0x1c4   : > { %v689_v41 = vrot.slane %v679_v38, 5  ;;  %v685_v42 = vrot.slane %v679_v38, 6  ;;  %v856_v44 = vrot.slane %v850_v43, 6  ;;  %v852_v45 = vrot.slane %v850_v43, 7 }
 0x1c5   : > { %501 = vrot.lane.b32.xlu0 %v500_v36, %s1336_s22  ;;  %497 = vrot.lane.b32.xlu1 %v496_v37, %s1337_s23  ;;  %v860_v46 = vrot.slane %v850_v43, 5 }
 0x1c9   : > { %682 = vrot.lane.b32.xlu0 %v681_v39, %s1337_s23  ;;  %505 = vrot.lane.b32.xlu1 %v504_v40, %s1338_s29 }
 0x1cd   : > { %690 = vrot.lane.b32.xlu0 %v689_v41, %s1338_s29  ;;  %686 = vrot.lane.b32.xlu1 %v685_v42, %s1336_s22 }
 0x1d1   : > { %857 = vrot.lane.b32.xlu0 %v856_v44, %s1336_s22  ;;  %853 = vrot.lane.b32.xlu1 %v852_v45, %s1337_s23  ;;  %s1531_s22 = scalar_lea.hbm %s1583_s7, %s1215_s19  ;;  %s1271_s23 = scalar_lea.vmem %s1525_s18, 768 }
 0x1d2   : > { %p1272_p11 = scmp.ne.s32.totalorder %s1525_s18, %s1271_s23 }
 0x1d4   : > { %p1273_p12 = pnand %p1272_p11, %p1420_p5 }
 0x1d5   : > { %861 = vrot.lane.b32.xlu1 %v860_v46, %s1338_s29  ;;  %s1339_s29 = smov [#allocation3]  }
 0x1d6   : > { %p1274_p13 = pneg %p1273_p12  ;;  %s1275_s8 = sshll.u32 %s1339_s29, 4  ;;  %s1276_s8 = int_to_ptr.vmem [resolvable:$false] %s1275_s8 }
 0x1d7   : > { %s1277_s9 = scalar_lea.vmem %s1276_s8, 1536  ;;  %p1278_p0 = scmp.lt.s32.totalorder %s1525_s18, %s1276_s8 }
 0x1d8   : > { %p1279_p1 = scmp.lt.s32.totalorder %s1277_s9, %s1271_s23 }
 0x1da   : > { %p1280_p2 = por %p1279_p1, %p1278_p0 }
 0x1dc   : > { %p1281_p3 = pnand %p1280_p2, %p1274_p13 }
 0x237   : > { %v502_v47 = vpop.permute.xlu0 %501  ;;  %v498_v48 = vpop.permute.xlu1 %497 }
 0x238   : > { %v509_v49 = vsel %vm508_vm5, %v494_v35, %v498_v48 }
 0x239   : > { %v511_v51 = vsel %vm510_vm6, %v509_v49, %v502_v47 }
 0x23b   : > { %v683_v50 = vpop.permute.xlu0 %682  ;;  %v506_v52 = vpop.permute.xlu1 %505 }
 0x23c   : > { %v513_v53 = vsel %vm512_vm7, %v511_v51, %v506_v52  ;;  %v693_v54 = vsel %vm508_vm5, %v679_v38, %v683_v50 }
 0x23d   : > { %1187 = vmatmul.mubr.msk.f32.vlgmr.msra.gmra.mxu1 %vm514_vm8, %v513_v53 }
 0x23e   : > { %1191 = vmatprep.mubr.msk.f32.mxu1 %vm514_vm8, %v492_v1 }
 0x23f   : > { %v691_v55 = vpop.permute.xlu0 %690  ;;  %v687_v56 = vpop.permute.xlu1 %686 }
 0x240   : > { %v694_v57 = vsel %vm510_vm6, %v693_v54, %v687_v56 }
 0x241   : > { %v695_v58 = vsel %vm512_vm7, %v694_v57, %v691_v55 }
 0x243   : > { %v858_v59 = vpop.permute.xlu0 %857  ;;  %v854_v60 = vpop.permute.xlu1 %853 }
 0x244   : > { %v864_v61 = vsel %vm508_vm5, %v850_v43, %v854_v60 }
 0x245   : > { %v865_v62 = vsel %vm510_vm6, %v864_v61, %v858_v59 }
 0x247   : > { %v862_v63 = vpop.permute.xlu1 %861 }
 0x248   : > { %v866_v0 = vsel %vm512_vm7, %v865_v62, %v862_v63 }
 0x2fd   : > { %v588_v2 = vpop.f32.mrf.mxu1 }
 0x2fe   : > { %1189 = vmatprep.subr.msk.mxu1 %vm518_vm4, %v588_v2 }
 0x2ff   : > { %v1188_v4 = vpop.f32.mrf.mxu1  ;;  %1190 = vmatpush3.msk.msra.mxu1 %vm518_vm4, %v588_v2 }
 0x300   : > { %1192 = vmatmul.mubr.msk.f32.vlgmr.msra.gmra.mxu1 %vm514_vm8, %v493_v3  ;;  %1194 = vmatprep.subr.mxu1 %v1334_v12 }
 0x301   : > { %1195 = vmatpush3.msk.msra.mxu1 %vm518_vm4, %v1473_v34  ;;  %1196 = vmatprep.mubr.msk.f32.mxu1 %vm1335_vm1, %v1334_v12 }
 0x302   : > { %1204 = vmatprep.subr.mxu1 %v1334_v12 }
 0x304   : > { %1197 = vmatmul.mubr.msk.f32.vlgmr.msra.gmra.mxu1 %vm514_vm8, %v695_v58 }
 0x305   : > { %1205 = vmatpush3.msk.msra.mxu1 %vm518_vm4, %v1473_v34  ;;  %1206 = vmatprep.mubr.msk.f32.mxu1 %vm1335_vm1, %v1334_v12 }
 0x308   : > { %1207 = vmatmul.mubr.msk.f32.vlgmr.msra.gmra.mxu1 %vm514_vm8, %v866_v0 }
 0x3c0   : > { %v1193_v5 = vpop.f32.mrf.mxu1 }
 0x3c1   : > { %678 = vst.msk [vmem:[%s271_s17 + $0x8] sm:$0xff] %vm676_vm9, %v1193_v5 }
 0x3c2   : > { %v667_v6 = vpop.f32.mrf.mxu1 }
 0x3c3   : > { %677 = vst.msk [vmem:[%s271_s17] sm:$0xff] %vm676_vm9, %v667_v6 }
 0x3c4   : > { %v765_v7 = vpop.f32.mrf.mxu1 }
 0x3c5   : > { %1199 = vmatprep.subr.msk.mxu0 %vm518_vm4, %v765_v7 }
 0x3c6   : > { %v1198_v8 = vpop.f32.mrf.mxu1  ;;  %1200 = vmatpush3.msk.msra.mxu0 %vm518_vm4, %v765_v7 }
 0x3c7   : > { %1202 = vmatmul.mubr.msk.f32.vlgmr.msra.gmra.mxu0 %vm514_vm8, %v493_v3 }
 0x3c8   : > { %v936_v9 = vpop.f32.mrf.mxu1  ;;  %1211 = vmatprep.mubr.msk.f32.mxu0 %vm514_vm8, %v492_v1 }
 0x3c9   : > { %1209 = vmatprep.subr.msk.mxu0 %vm518_vm4, %v936_v9 }
 0x3ca   : > { %v1208_v10 = vpop.f32.mrf.mxu1  ;;  %1210 = vmatpush3.msk.msra.mxu0 %vm518_vm4, %v936_v9 }
 0x3cb   : > { %1212 = vmatmul.mubr.msk.f32.vlgmr.msra.gmra.mxu0 %vm514_vm8, %v493_v3 }
 0x487   : > { %v1203_v11 = vpop.f32.mrf.mxu0 }
 0x488   : > { %1123 = vst.msk [vmem:[%s271_s17 + $0x18] sm:$0xff] %vm676_vm9, %v1203_v11 }
 0x489   : > { %v838_v12 = vpop.f32.mrf.mxu0 }
 0x48a   : > { %1122 = vst.msk [vmem:[%s271_s17 + $0x10] sm:$0xff] %vm676_vm9, %v838_v12 }
 0x48b   : > { %v1213_v13 = vpop.f32.mrf.mxu0 }
 0x48c   : > { %1130 = vst.msk [vmem:[%s271_s17 + $0x28] sm:$0xff] %vm676_vm9, %v1213_v13 }
 0x48d   : > { %v1009_v14 = vpop.f32.mrf.mxu0 }
 0x48e   : > { %1129 = vst.msk [vmem:[%s271_s17 + $0x20] sm:$0xff] %vm676_vm9, %v1009_v14 }
 0x48f   : > { %1284 = shalt.err (!%p1281_p3)
}
 0x490   : > { %s1285_s13 = scalar_lea.hbm %s1531_s22, 768  ;;  %s1289_s16 = scalar_lea.hbm %s1583_s7, 1536 }
 0x491   : > { %p1286_p4 = scmp.ne.s32.totalorder %s1531_s22, %s1285_s13  ;;  %p1290_p9 = scmp.lt.s32.totalorder %s1531_s22, %s1583_s7 }
 0x492   : > { %p1291_p10 = scmp.lt.s32.totalorder %s1289_s16, %s1285_s13 }
 0x493   : > { %p1287_p7 = pnand %p1286_p4, %p1420_p5 }
 0x494   : > { %p1292_p11 = por %p1291_p10, %p1290_p9 }
 0x495   : > { %p1288_p8 = pneg %p1287_p7 }
 0x497   : > { %p1293_p12 = pnand %p1292_p11, %p1288_p8 }
 0x499   : > { %1296 = shalt.err (!%p1293_p12)
}
 0x49a   : > { %s1340_s20 = smov 128   ;;  %s1341_s21 = smov 8  }
 0x49b   : > { %1216 = dma.vmem_to_hbm [thread:$0]  (%p1420_p5), %s1525_s18, 768, %s1531_s22, %s1536_s28, %s1340_s20, %s1340_s20, %s1341_s21  }
 0x49c PF: > { %p1222_p13 = scmp.ge.s32.totalorder %s1331_s27, 2  ;;  %s1050_s23 = sand.u32 1, %s1319_s24  }
 0x49d   : > { %s1051_s29 = scalar_lea.sflag [#allocation4], %s1050_s23 }
 0x49e   : > { %p1219_p0 = pnand %p1222_p13, %p1424_p6 }
 0x4a0   : > { %p1220_p1 = pneg %p1219_p0 }
 0x4a2   : > { %1314 = dma.done.wait (%p1220_p1), %s1051_s29, 768  }
 0x4a3   : > { %1316 = vsyncadd (%p1220_p1), %s1051_s29, 4294966528  ;;  %p17_p2 = scmp.ge.s32.totalorder %s1407_s30, 4   ;;  %s1586_s24 = smov %s1323_s25 }
 0x4a4   : > { %s1587_s25 = smov %s1327_s26  ;;  %s1588_s26 = smov %s1418_s10 }
 0x4a5   : > { %s1589_s27 = smov %s1407_s30  ;;  %19 = sbr.rel (!%p17_p2) target bundleno = 3 (0x3), region = 85 }
 0x4aa   :  { %1056 = vsyncpa [#allocation4], 1 }
 0x4ab   :  { %1058 = vsyncpa [#allocation4 + $0x1], 1 }

</bundles_post_ra>
